<compile_context>
chip_gen: v6e
topology: v6e:2x2x1
jax: 0.10.0
libtpu: 0.0.40
codegen_flags: <defaults>
</compile_context>

<pallas_src>
import functools

import jax
import jax.numpy as jnp
from jax.experimental import pallas as pl
from jax.experimental.pallas import tpu as pltpu


def _round_up(x, m):
    return (x + m - 1) // m * m


def _vmem_capacity_bytes():
    """Physical VMEM per core; conservative fallback if the query fails."""
    try:
        return int(pltpu.get_tpu_info().vmem_capacity_bytes)
    except Exception:  # pragma: no cover - off-TPU / API drift fallback
        return 64 * 1024 * 1024


def _conv_kernel(taps_ref, w_ref, b_ref, o_ref):
    # taps_ref: (9*Cin, tile_L)  space-to-depth activations (compute dtype)
    # w_ref:    (Cout, 9*Cin)    packed conv weights        (compute dtype)
    # b_ref:    (Cout, 1)        bias, f32
    # o_ref:    (Cout, tile_L)   lane-dense output tile
    acc = jnp.dot(w_ref[...], taps_ref[...], preferred_element_type=jnp.float32)
    o_ref[...] = (acc + b_ref[...]).astype(o_ref.dtype)


@functools.partial(jax.jit, static_argnames=("compute_dtype",))
def downsample_forward(x_nchw, weight_oihw, bias, *, compute_dtype=jnp.bfloat16):
    """Forward pass of Downsample. x_nchw: (N, C, H, W)."""
    n, c, h, w = x_nchw.shape
    cout, cin, kh_, kw_ = weight_oihw.shape
    assert (cout, cin, kh_, kw_) == (c, c, 3, 3)

    # PyTorch output size for pad=(0,1,0,1), kernel=3, stride=2.
    ho = (h + 1 - 3) // 2 + 1
    wo = (w + 1 - 3) // 2 + 1
    l = ho * wo

    # ---- hardware-aware tile / VMEM sizing (all static Python ints) --------
    in_itemsize = jnp.dtype(compute_dtype).itemsize
    out_itemsize = jnp.dtype(x_nchw.dtype).itemsize
    vmem_cap = _vmem_capacity_bytes()
    big_vmem = vmem_cap >= 100 * 1024 * 1024            # v5e / v6e (128 MiB)
    vmem_cap_target = (100 if big_vmem else 48) * 1024 * 1024
    w_bytes = cout * 9 * cin * in_itemsize
    # Bytes per output lane of the per-step working set:
    #   double-buffered taps tile + double-buffered output tile + f32 dot result
    per_lane = 2 * 9 * cin * in_itemsize + 2 * cout * out_itemsize + cout * 4
    tile_budget = max(vmem_cap_target // 2 - 2 * w_bytes, 4 * 1024 * 1024)
    tile_l = int(min(_round_up(l, 128), 2048,
                     max(128, (tile_budget // per_lane) // 128 * 128)))
    lp = _round_up(l, tile_l)
    num_l_tiles = lp // tile_l

    # ---- layout-only prep (cast first, single fused pad + 9 strided slices) -
    x_cd = x_nchw.astype(compute_dtype)
    pad_h = max(2 * ho + 1 - h, 0)        # includes the PyTorch bottom zero row
    pad_w = max(2 * wo + 1 - w, 0)        # includes the PyTorch right zero col
    x_pad = jnp.pad(x_cd, ((0, 0), (0, 0), (0, pad_h), (0, pad_w)))
    # Tap t = kh*3 + kw reads x_pad[:, :, 2*oh+kh, 2*ow+kw]; stack along channels.
    taps = jnp.concatenate(
        [x_pad[:, :, kh:kh + 2 * ho:2, kw:kw + 2 * wo:2]
         for kh in range(3) for kw in range(3)],
        axis=1)                                            # (N, 9*Cin, Ho, Wo)
    taps = taps.reshape(n, 9 * cin, l)
    if lp != l:
        taps = jnp.pad(taps, ((0, 0), (0, 0), (0, lp - l)))

    # Pack the 3x3 weights in the same tap order -> (Cout, 9*Cin).
    w_packed = jnp.concatenate(
        [weight_oihw[:, :, kh, kw] for kh in range(3) for kw in range(3)],
        axis=1).astype(compute_dtype)
    b_col = bias.reshape(cout, 1).astype(jnp.float32)

    # ---- cost / VMEM accounting (true per-step working set) ----------------
    flops = 2 * n * cout * 9 * cin * lp
    bytes_accessed = (n * 9 * cin * lp * in_itemsize
                      + w_packed.size * in_itemsize + cout * 4
                      + n * cout * lp * out_itemsize)
    step_bytes = (2 * 9 * cin * tile_l * in_itemsize       # taps tile, 2 bufs
                  + 2 * cout * tile_l * out_itemsize       # output tile, 2 bufs
                  + cout * tile_l * 4                      # f32 matmul result
                  + 2 * w_packed.size * in_itemsize        # resident weights
                  + 2 * cout * 4)                          # resident bias
    vmem_limit = int(min(max(2 * step_bytes, 32 * 1024 * 1024), vmem_cap_target))

    out_flat = pl.pallas_call(
        _conv_kernel,
        out_shape=jax.ShapeDtypeStruct((n, cout, lp), x_nchw.dtype),
        grid=(n, num_l_tiles),
        in_specs=[
            pl.BlockSpec((None, 9 * cin, tile_l), lambda i, j: (i, 0, j)),
            pl.BlockSpec((cout, 9 * cin), lambda i, j: (0, 0)),
            pl.BlockSpec((cout, 1), lambda i, j: (0, 0)),
        ],
        out_specs=pl.BlockSpec((None, cout, tile_l), lambda i, j: (i, 0, j)),
        compiler_params=pltpu.CompilerParams(
            dimension_semantics=("parallel", "parallel"),
            vmem_limit_bytes=vmem_limit,
        ),
        cost_estimate=pl.CostEstimate(
            flops=int(flops), transcendentals=0,
            bytes_accessed=int(bytes_accessed)),
    )(taps, w_packed, b_col)

    # (N, Cout, L) reshapes straight to NCHW.  The [:, :, :l] slice is an
    # identity when L is already a multiple of tile_L; otherwise it only
    # touches the (small) output, never the activations.
    return out_flat[:, :, :l].reshape(n, cout, ho, wo)


def _init_params(key, in_channels):
    """Deterministic Conv2d(in_channels, in_channels, 3) init (PyTorch-like)."""
    kw_, kb_ = jax.random.split(key)
    fan_in = in_channels * 3 * 3
    bound = 1.0 / jnp.sqrt(fan_in)
    weight = jax.random.uniform(
        kw_, (in_channels, in_channels, 3, 3), jnp.float32, -bound, bound)
    bias = jax.random.uniform(kb_, (in_channels,), jnp.float32, -bound, bound)
    return weight, bias


if __name__ == "__main__":
    key = jax.random.PRNGKey(0)
    kx, kp = jax.random.split(key)

    N, C, H, W = 2, 4, 16, 16
    x = jax.random.normal(kx, (N, C, H, W), jnp.float32)
    weight, bias = _init_params(kp, C)

    y = jax.block_until_ready(downsample_forward(x, weight, bias))

    # Reference: same bf16-rounded operands, f32 accumulation via XLA conv
    # (pad right/bottom by 1, stride 2 -> matches PyTorch Downsample).
    # NOTE: fidelity vs a pure-f32 PyTorch conv is ~1e-2 relative for large C
    # due to the bf16 MXU inputs; pass compute_dtype=jnp.float32 if needed.
    xq = x.astype(jnp.bfloat16).astype(jnp.float32)
    wq = weight.astype(jnp.bfloat16).astype(jnp.float32)
    x_pad = jnp.pad(xq, ((0, 0), (0, 0), (0, 1), (0, 1)))
    y_ref = jax.lax.conv_general_dilated(
        x_pad, wq, window_strides=(2, 2), padding="VALID",
        dimension_numbers=("NCHW", "OIHW", "NCHW"),
        precision=jax.lax.Precision.HIGHEST,
    ) + bias.reshape(1, C, 1, 1)

    assert y.shape == (N, C, 8, 8), y.shape
    assert jnp.allclose(y, y_ref, atol=2e-3, rtol=2e-3), "mismatch vs reference"
    print("KERNEL_OK")
</pallas_src>

<mosaic_0001>
module attributes {stable_mosaic.version = 11 : i64} {
  func.func @_conv_kernel(%arg0: i32, %arg1: i32, %arg2: memref<1x36x128xbf16, #tpu.memory_space<vmem>>, %arg3: memref<4x36xbf16, #tpu.memory_space<vmem>>, %arg4: memref<4x1xf32, #tpu.memory_space<vmem>>, %arg5: memref<1x4x128xf32, #tpu.memory_space<vmem>>) attributes {dimension_semantics = [#tpu.dimension_semantics<parallel>, #tpu.dimension_semantics<parallel>], iteration_bounds = array<i64: 2, 1>, scalar_prefetch = 0 : i64, scratch_operands = 0 : i64, tpu.core_type = #tpu.core_type<tc>, window_params = [{transform_indices = @transform_0, window_bounds = array<i64: 1, 36, 128>}, {pipeline_mode = #tpu.pipeline_mode<synchronous>, transform_indices = @transform_1, window_bounds = array<i64: 4, 36>}, {pipeline_mode = #tpu.pipeline_mode<synchronous>, transform_indices = @transform_2, window_bounds = array<i64: 4, 1>}, {transform_indices = @transform_3, window_bounds = array<i64: 1, 4, 128>}]} {
    %c0 = arith.constant 0 : index
    %c0_0 = arith.constant 0 : index
    %0 = vector.load %arg3[%c0, %c0_0] : memref<4x36xbf16, #tpu.memory_space<vmem>>, vector<4x36xbf16>
    %c0_1 = arith.constant 0 : index
    %c0_2 = arith.constant 0 : index
    %c0_3 = arith.constant 0 : index
    %1 = vector.load %arg2[%c0_1, %c0_2, %c0_3] : memref<1x36x128xbf16, #tpu.memory_space<vmem>>, vector<1x36x128xbf16>
    %2 = vector.shape_cast %1 : vector<1x36x128xbf16> to vector<36x128xbf16>
    %cst = arith.constant dense<0.000000e+00> : vector<4x128xf32>
    %3 = tpu.matmul %0, %2, %cst {dimension_numbers = #tpu.dot_dimension_numbers<[1], [0], [0], [1], [0, 0, 1, 1], [], []>} : vector<4x36xbf16>, vector<36x128xbf16>, vector<4x128xf32> -> vector<4x128xf32>
    %c0_4 = arith.constant 0 : index
    %c0_5 = arith.constant 0 : index
    %4 = vector.load %arg4[%c0_4, %c0_5] : memref<4x1xf32, #tpu.memory_space<vmem>>, vector<4x1xf32>
    %5 = vector.broadcast %4 : vector<4x1xf32> to vector<4x128xf32>
    %6 = arith.addf %3, %5 : vector<4x128xf32>
    %c0_6 = arith.constant 0 : index
    %c0_7 = arith.constant 0 : index
    %c0_8 = arith.constant 0 : index
    %7 = vector.load %arg5[%c0_6, %c0_7, %c0_8] : memref<1x4x128xf32, #tpu.memory_space<vmem>>, vector<1x4x128xf32>
    %8 = vector.shape_cast %7 : vector<1x4x128xf32> to vector<4x128xf32>
    %9 = vector.shape_cast %6 : vector<4x128xf32> to vector<1x4x128xf32>
    tpu.vector_store %arg5[%c0_6, %c0_7, %c0_8], %9 {strides = array<i32>} : memref<1x4x128xf32, #tpu.memory_space<vmem>>, vector<1x4x128xf32>,
    return
  }
  func.func @transform_0(%arg0: i32, %arg1: i32) -> (i32, i32, i32) {
    %c0_i32 = arith.constant 0 : i32
    %c0_i32_0 = arith.constant 0 : i32
    return %arg0, %c0_i32, %arg1 : i32, i32, i32
  }
  func.func @transform_1(%arg0: i32, %arg1: i32) -> (i32, i32) {
    %c0_i32 = arith.constant 0 : i32
    %c0_i32_0 = arith.constant 0 : i32
    %c0_i32_1 = arith.constant 0 : i32
    return %c0_i32, %c0_i32_0 : i32, i32
  }
  func.func @transform_2(%arg0: i32, %arg1: i32) -> (i32, i32) {
    %c0_i32 = arith.constant 0 : i32
    %c0_i32_0 = arith.constant 0 : i32
    %c0_i32_1 = arith.constant 0 : i32
    return %c0_i32, %c0_i32_0 : i32, i32
  }
  func.func @transform_3(%arg0: i32, %arg1: i32) -> (i32, i32, i32) {
    %c0_i32 = arith.constant 0 : i32
    %c0_i32_0 = arith.constant 0 : i32
    return %arg0, %c0_i32, %arg1 : i32, i32, i32
  }
}

</mosaic_0001>

<bundles_post_ra>
// kernel: downsample_forward.1
= control target key start
LH: loop header
LB: loop body
LE: loop exit
PB: predicated region body
PF: predicated region fallthrough
CT: control target
= control target key end

     0   :  { %s460_s12 = smov 0   ;;  %s462_s13 = smov 0   ;;  %s499_s0 = inlined_call_operand.vmem [shape: bf16[2,36,128], index: 0, kind: input, shape index: {}]   ;;  %s500_s1 = inlined_call_operand.vmem [shape: bf16[4,36], index: 1, kind: input, shape index: {}]   ;;  %s501_s2 = inlined_call_operand.vmem [shape: f32[4,1], index: 2, kind: input, shape index: {}]   ;;  %s502_s3 = inlined_call_operand.vmem [shape: f32[2,4,128], index: 3, kind: output, shape index: {}]  }
   0x1   :  { %s464_s14 = smov 0  }
   0x2 LB: > { %s25_s15 = sadd.s32 1, %s431_s13  ;;  %p358_p0 = scmp.ge.s32.totalorder %s435_s14, 1  ;;  %s435_s14 = sphi %s464_s14, %s13_s14   ;;  %s431_s13 = sphi %s462_s13, %s504_s13   ;;  %s427_s12 = sphi %s460_s12, %s503_s12  }
   0x3   : > { %p27_p1 = scmp.ge.s32.totalorder %s25_s15, 2  ;;  %p156_p2 = scmp.lt.s32.totalorder %s435_s14, 3 }
   0x5   : > { %s506_s15 = smov (%p27_p1, %s25_s15), 0  ;;  %p157_p3 = pnand %p358_p0, %p156_p2 }
   0x6   : > { %p185_p4 = scmp.lt.s32.totalorder (!%p157_p3), %s427_s12, 1 }
   0x7   : > { %160 = sbr.rel (%p157_p3) target bundleno = 228 (0xe4), region = 32 }
   0xc   : > { %v437_v0 = vmov 0.0   ;;  %vm438_vm0 = vmmov 0   ;;  %v207_v1 = vld [vmem:[%s501_s2] sm:$0xf]  ;;  %s508_s12 = smov (!%p185_p4, %s427_s12), 1  ;;  %v439_v2 = vmov 0  }
   0xd   : > { %371 = vmatprep.subr.bf16.mxu0 %v437_v0  ;;  %377 = vmatprep.mubr.msk.bf16.mxu0 %vm438_vm0, %v437_v0  ;;  %s381_s18 = smul.u32 20, %s508_s12  ;;  %vm232_vm1 = vcmask 1041408   ;;  %v201_v7 = vld [vmem:[%s500_s1] sm:$0x3]  ;;  %vm228_vm2 = vcmask 293888   ;;  %s360_s24 = sshll.u32 %s508_s12, 2 }
   0xe   : > { %409 = vset.pattern.permute.xlu0 %v439_v2  ;;  %s199_s27 = scalar_lea.vmem %s502_s3, %s360_s24 }
   0xf   : > { %210 = vperm.xlu0 %409, %v207_v1   ;;  %s192_s21 = scalar_lea.vmem %s499_s0, %s381_s18 }
  0x10   : > { %v410_v3 = vld [vmem:[%s192_s21 + $0x10] ss:$0 sps:$4 sm:$0x33]   ;;  %v411_v5 = vld [vmem:[%s192_s21 + $0x8] sm:$0xff]   ;;  %v412_v6 = vld [vmem:[%s192_s21] sm:$0xff]  }
  0x11   : > { %v234_v4 = vsel %vm232_vm1, %v410_v3, 0 }
  0x12   : > { %372 = vmatpush3.bf16.msra.mxu0 %v234_v4 }
  0x13   : > { %373 = vmatprep.subr.bf16.mxu0 %v437_v0 }
  0x16   : > { %374 = vmatpush3.bf16.msra.mxu0 %v411_v5 }
  0x17   : > { %375 = vmatprep.subr.bf16.mxu0 %v437_v0 }
  0x1a   : > { %376 = vmatpush3.bf16.msra.mxu0 %v412_v6 }
  0x1d   : > { %378 = vmatmul.mubr.msk.bf16.vlgmr.msra.gmra.mxu0 %vm228_vm2, %v201_v7 }
  0x8a   : > { %v211_v8 = vpop.permute.xlu0 %210 }
  0xdd   : > { %v270_v9 = vpop.f32.mrf.mxu0 }
  0xde   : > { %v271_v10 = vadd.f32 %v270_v9, %v211_v8 }
  0xdf   : > { %v379_v11 = vpop.f32.mrf.mxu0 }
  0xe0   : > { %276 = vst [vmem:[%s199_s27] sm:$0xf] %v271_v10 }
  0xe1   : > { %v273_v12 = vpop.f32.mrf.mxu0 }
  0xe3   : > { %v380_v13 = vpop.f32.mrf.mxu0 }
  0xe4 PF: > { %s13_s14 = sadd.s32 1, %s435_s14   ;;  %s503_s12 = smov %s431_s13 }
  0xe5   : > { %p10_p5 = scmp.ge.s32.totalorder %s13_s14, 4   ;;  %s504_s13 = smov %s506_s15 }
  0xe7   :  { %12 = sbr.rel (!%p10_p5) target bundleno = 2 (0x2), region = 62 }

</bundles_post_ra>
